<compile_context>
chip_gen: v7x
topology: tpu7x:2x2x1
jax: 0.10.0
libtpu: 0.0.40
codegen_flags: <defaults>
</compile_context>

<pallas_src>
import math
import numpy as np
import jax
import jax.numpy as jnp
from jax.experimental import pallas as pl
from jax.experimental.pallas import tpu as pltpu

WIN = 11
SIGMA = 1.5
C1 = (0.01 * 255.0) ** 2   # matches the PyTorch module (hard-coded 255 dynamic range)
C2 = (0.03 * 255.0) ** 2


# ----------------------------- constant operator construction -----------------------------
def _gaussian_1d():
    x = np.arange(WIN, dtype=np.float64) - WIN // 2
    g = np.exp(-(x * x) / (2.0 * SIGMA * SIGMA))
    return g / g.sum()


def _blur_toeplitz(n):
    """A with (A @ x)[i] = sum_k g[k] * x_zeropad[i + k - 5]  (11-tap Gaussian, zero 'same')."""
    g = _gaussian_1d()
    half = WIN // 2
    A = np.zeros((n, n), np.float64)
    for i in range(n):
        for k in range(WIN):
            r = i + k - half
            if 0 <= r < n:
                A[i, r] += g[k]
    return A


def _pair_ops(n):
    """Pair sum / difference (even - odd) operators of shape (n//2, n)."""
    half = n // 2
    S = np.zeros((half, n), np.float64)
    D = np.zeros((half, n), np.float64)
    for i in range(half):
        S[i, 2 * i] = 1.0
        S[i, 2 * i + 1] = 1.0
        D[i, 2 * i] = 1.0
        D[i, 2 * i + 1] = -1.0
    return S, D


def _block_diag(m, reps):
    r, c = m.shape
    out = np.zeros((reps * r, reps * c), m.dtype)
    for i in range(reps):
        out[i * r:(i + 1) * r, i * c:(i + 1) * c] = m
    return out


def _build_constants(P, H, W):
    Hh, Wh = H // 2, W // 2
    # --- Haar, W (lane) axis: per-plane right operands acting on the (H, P*W) slab ---
    Sw, Dw = _pair_ops(W)                          # (Wh, W)
    CS = _block_diag(Sw.T, P)                      # (P*W, P*Wh): column pair sums
    CD = _block_diag(Dw.T, P)                      # (P*W, P*Wh): column pair diffs (even-odd)
    CSCD = np.concatenate([CS, CD], axis=1)        # (P*W, 2*P*Wh): one fused dot, N >= 256
    # --- Haar, H (sublane) axis: per-plane-H-sized LEFT operators (no P scaling) ---
    Rs, Rd = _pair_ops(H)                          # (Hh, H)
    L = np.concatenate([0.5 * Rs, (1.0 / 6.0) * Rd], axis=0)   # (H, H): [t_low ; part of t_high]
    L3 = (1.0 / 6.0) * (Rs + Rd)                   # (Hh, H): remaining t_high term (acts on cd)
    # --- separable 11-tap Gaussian blur (zero 'same' padding) ---
    Aw = _blur_toeplitz(Wh).T                      # (Wh, Wh) right operand (blur along W)
    AWP = _block_diag(Aw, P)                       # (P*Wh, P*Wh): blur never crosses planes
    Ah = _blur_toeplitz(Hh)                        # (Hh, Hh) left operand (blur along H)
    AH10 = _block_diag(Ah, 10)                     # (10*Hh, 10*Hh): all 10 fields in ONE dot
    return tuple(jnp.asarray(m, jnp.float32) for m in (CSCD, L, L3, AWP, AH10))


# ----------------------------- fused Pallas kernel -----------------------------
def _frequent_loss_kernel(t_ref, lo_ref, hi_ref, cscd_ref, l_ref, l3_ref,
                          awp_ref, ah10_ref, out_ref, ops_ref):
    Hh, PWh = lo_ref.shape

    # ---- Haar DWT (J=1, 'haar', zero mode) of the P target planes: 3 MXU dots ----
    cc = jnp.dot(t_ref[...], cscd_ref[...], preferred_element_type=jnp.float32)  # (H, 2*PWh)
    cs = cc[:, :PWh]                                   # column pair sums   (lane-aligned slice)
    cd = cc[:, PWh:]                                   # column pair diffs
    tlth = jnp.dot(l_ref[...], cs, preferred_element_type=jnp.float32)           # (H, PWh)
    t_low = tlth[:Hh, :]                                                          # Yl1 (LL band)
    t_high = tlth[Hh:, :] + jnp.dot(l3_ref[...], cd,
                                    preferred_element_type=jnp.float32)           # mean(LH,HL,HH)

    x1l = lo_ref[...]
    x1h = hi_ref[...]

    # ---- build the 10 blur operands as one sublane-stacked slab in VMEM scratch ----
    # (lane-aligned unmasked stores; avoids a consumed-once jnp.concatenate)
    fields = (x1l, t_low, x1l * x1l, t_low * t_low, x1l * t_low,
              x1h, t_high, x1h * x1h, t_high * t_high, x1h * t_high)
    for f, v in enumerate(fields):
        ops_ref[pl.ds(f * Hh, Hh), :] = v

    # ---- separable 11x11 Gaussian blur of all 10 fields: 2 dots total ----
    ops_w = jnp.dot(ops_ref[...], awp_ref[...], preferred_element_type=jnp.float32)  # W pass
    blur = jnp.dot(ah10_ref[...], ops_w, preferred_element_type=jnp.float32)         # H pass

    def _field(i):
        return blur[i * Hh:(i + 1) * Hh, :]

    def _ssim_colsum(o):                       # o = first field index of a 5-field SSIM group
        mu1, mu2 = _field(o + 0), _field(o + 1)
        e11, e22, e12 = _field(o + 2), _field(o + 3), _field(o + 4)
        mu1_sq, mu2_sq, mu1_mu2 = mu1 * mu1, mu2 * mu2, mu1 * mu2
        num = (2.0 * mu1_mu2 + C1) * (2.0 * (e12 - mu1_mu2) + C2)
        den = (mu1_sq + mu2_sq + C1) * ((e11 - mu1_sq) + (e22 - mu2_sq) + C2)
        return jnp.sum(num / den, axis=0, keepdims=True)        # (1, PWh) per-column sums

    stacked = jnp.concatenate([_ssim_colsum(0), _ssim_colsum(5)], axis=0)  # (2, PWh)
    out_ref[...] = stacked.reshape(1, 2, PWh)


# ----------------------------- plane-block (tiling) policy -----------------------------
def _pick_plane_block(N, Wh):
    """Planes per grid step: lane width P*Wh targeted at ~128-256 and 128-aligned whenever
    the grid has >1 step; on 2-TC chips (v7x / megacore) prefer G >= 2 when alignment allows."""
    unit = 128 // math.gcd(128, Wh)                       # smallest P with (P*Wh) % 128 == 0
    cap = max(unit, (max(256 // max(Wh, 1), 1) // unit) * unit)
    try:
        kind = jax.devices()[0].device_kind.lower()
    except Exception:
        kind = ""
    if any(t in kind for t in ("v7", "v4", "v5p")) and N > unit:
        half = ((N + 1) // 2 // unit) * unit              # largest aligned P giving G >= 2
        if half >= unit:
            return min(cap, half)
    return N if N <= cap else cap                         # single-TC: fewest, fattest steps


# ----------------------------- wrapper -----------------------------
def frequent_loss(high, low, target, alpha_low=1.0, alpha_high=1.0, plane_block=None):
    """Forward of FrequentLoss: returns (total, alpha_low*low_loss, alpha_high*high_loss)."""
    assert high.ndim == 4 and low.ndim == 4 and target.ndim == 4, "inputs must be 4D [B,C,H,W]"
    B, C, H, W = target.shape
    assert H % 16 == 0 and W % 2 == 0, "H must be a multiple of 16 and W even"
    Hh, Wh = H // 2, W // 2
    assert low.shape == (B, C, Hh, Wh) and high.shape == (B, C, Hh, Wh)

    N = B * C
    P = int(plane_block) if plane_block is not None else _pick_plane_block(N, Wh)
    P = max(1, min(P, N))
    # Mosaic constraint: when the grid has >1 step, the lane-dim block (P*Wh) must be
    # 128-aligned.  Round P up to the alignment unit (possibly collapsing to a single step).
    unit = 128 // math.gcd(128, Wh)
    if P < N and P % unit != 0:
        P = min(N, ((P + unit - 1) // unit) * unit)
    G = (N + P - 1) // P
    Npad = G * P

    t = target.reshape(N, H, W).astype(jnp.float32)
    lo = low.reshape(N, Hh, Wh).astype(jnp.float32)
    hi = high.reshape(N, Hh, Wh).astype(jnp.float32)
    if Npad != N:                          # zero planes; their sums are sliced off below
        pad = ((0, Npad - N), (0, 0), (0, 0))
        t, lo, hi = jnp.pad(t, pad), jnp.pad(lo, pad), jnp.pad(hi, pad)

    # Planes onto the LANE axis (plane-major columns).  Pure wrapper-side layout plumbing.
    t2 = jnp.transpose(t, (1, 0, 2)).reshape(H, Npad * W)
    lo2 = jnp.transpose(lo, (1, 0, 2)).reshape(Hh, Npad * Wh)
    hi2 = jnp.transpose(hi, (1, 0, 2)).reshape(Hh, Npad * Wh)

    CSCD, L, L3, AWP, AH10 = _build_constants(P, H, W)
    PW, PWh = P * W, P * Wh

    col_sums = pl.pallas_call(
        _frequent_loss_kernel,
        out_shape=jax.ShapeDtypeStruct((G, 2, PWh), jnp.float32),
        grid=(G,),
        in_specs=[
            pl.BlockSpec((H, PW), lambda g: (0, g)),            # target planes (lane-stacked)
            pl.BlockSpec((Hh, PWh), lambda g: (0, g)),          # low  prediction
            pl.BlockSpec((Hh, PWh), lambda g: (0, g)),          # high prediction
            pl.BlockSpec((PW, 2 * PWh), lambda g: (0, 0)),      # fused column pair sum|diff
            pl.BlockSpec((H, H), lambda g: (0, 0)),             # [0.5*Rs ; (1/6)*Rd]
            pl.BlockSpec((Hh, H), lambda g: (0, 0)),            # (1/6)*(Rs + Rd)
            pl.BlockSpec((PWh, PWh), lambda g: (0, 0)),         # per-plane Gaussian blur (W)
            pl.BlockSpec((10 * Hh, 10 * Hh), lambda g: (0, 0)), # per-field Gaussian blur (H)
        ],
        out_specs=pl.BlockSpec((1, 2, PWh), lambda g: (g, 0, 0)),
        scratch_shapes=[pltpu.VMEM((10 * Hh, PWh), jnp.float32)],
        compiler_params=pltpu.CompilerParams(
            dimension_semantics=("parallel",),
            vmem_limit_bytes=32 * 1024 * 1024),                 # safe under v7x's 64 MiB too
    )(t2, lo2, hi2, CSCD, L, L3, AWP, AH10)

    # (G, 2, P*Wh) -> per-plane columns -> drop zero-padded planes -> mean over N*Hh*Wh.
    cs = jnp.transpose(col_sums.reshape(G, 2, P, Wh), (1, 0, 2, 3)).reshape(2, Npad, Wh)[:, :N]
    denom = float(N) * float(Hh) * float(Wh)
    ssim_low = jnp.sum(cs[0]) / denom
    ssim_high = jnp.sum(cs[1]) / denom
    low_term = alpha_low * (1.0 - ssim_low)
    high_term = alpha_high * (1.0 - ssim_high)
    # Note: the module's decompose() also builds a second-level "mid" band, but forward()
    # never uses it, so it is intentionally not computed.
    return low_term + high_term, low_term, high_term


# ----------------------------- demo -----------------------------
if __name__ == "__main__":
    key = jax.random.PRNGKey(0)
    k1, k2, k3 = jax.random.split(key, 3)
    B, C, H, W = 2, 4, 32, 32
    target = jax.random.uniform(k1, (B, C, H, W), jnp.float32)
    low = jax.random.uniform(k2, (B, C, H // 2, W // 2), jnp.float32)
    high = jax.random.normal(k3, (B, C, H // 2, W // 2), jnp.float32) * 0.1

    total, low_term, high_term = jax.jit(frequent_loss)(high, low, target)
    jax.block_until_ready((total, low_term, high_term))
    assert jnp.isfinite(total) and jnp.isfinite(low_term) and jnp.isfinite(high_term)
    print("KERNEL_OK")
</pallas_src>

<mosaic_0001>
module attributes {stable_mosaic.version = 11 : i64} {
  func.func @_frequent_loss_kernel(%arg0: i32, %arg1: memref<32x256xf32, #tpu.memory_space<vmem>>, %arg2: memref<16x128xf32, #tpu.memory_space<vmem>>, %arg3: memref<16x128xf32, #tpu.memory_space<vmem>>, %arg4: memref<256x256xf32, #tpu.memory_space<vmem>>, %arg5: memref<32x32xf32, #tpu.memory_space<vmem>>, %arg6: memref<16x32xf32, #tpu.memory_space<vmem>>, %arg7: memref<128x128xf32, #tpu.memory_space<vmem>>, %arg8: memref<160x160xf32, #tpu.memory_space<vmem>>, %arg9: memref<1x2x128xf32, #tpu.memory_space<vmem>>, %arg10: memref<160x128xf32, #tpu.memory_space<vmem>>) attributes {dimension_semantics = [#tpu.dimension_semantics<parallel>], iteration_bounds = array<i64: 1>, scalar_prefetch = 0 : i64, scratch_operands = 1 : i64, tpu.core_type = #tpu.core_type<tc>, window_params = [{transform_indices = @transform_0, window_bounds = array<i64: 32, 256>}, {transform_indices = @transform_1, window_bounds = array<i64: 16, 128>}, {transform_indices = @transform_2, window_bounds = array<i64: 16, 128>}, {pipeline_mode = #tpu.pipeline_mode<synchronous>, transform_indices = @transform_3, window_bounds = array<i64: 256, 256>}, {pipeline_mode = #tpu.pipeline_mode<synchronous>, transform_indices = @transform_4, window_bounds = array<i64: 32, 32>}, {pipeline_mode = #tpu.pipeline_mode<synchronous>, transform_indices = @transform_5, window_bounds = array<i64: 16, 32>}, {pipeline_mode = #tpu.pipeline_mode<synchronous>, transform_indices = @transform_6, window_bounds = array<i64: 128, 128>}, {pipeline_mode = #tpu.pipeline_mode<synchronous>, transform_indices = @transform_7, window_bounds = array<i64: 160, 160>}, {transform_indices = @transform_8, window_bounds = array<i64: 1, 2, 128>}]} {
    %c0 = arith.constant 0 : index
    %c0_0 = arith.constant 0 : index
    %0 = vector.load %arg1[%c0, %c0_0] : memref<32x256xf32, #tpu.memory_space<vmem>>, vector<32x256xf32>
    %c0_1 = arith.constant 0 : index
    %c0_2 = arith.constant 0 : index
    %1 = vector.load %arg4[%c0_1, %c0_2] : memref<256x256xf32, #tpu.memory_space<vmem>>, vector<256x256xf32>
    %cst = arith.constant dense<0.000000e+00> : vector<32x256xf32>
    %2 = tpu.matmul %0, %1, %cst {dimension_numbers = #tpu.dot_dimension_numbers<[1], [0], [0], [1], [0, 0, 1, 1], [], []>} : vector<32x256xf32>, vector<256x256xf32>, vector<32x256xf32> -> vector<32x256xf32>
    %3 = vector.extract_strided_slice %2 {offsets = [0, 0], sizes = [32, 128], strides = [1, 1]} : vector<32x256xf32> to vector<32x128xf32>
    %4 = vector.extract_strided_slice %2 {offsets = [0, 128], sizes = [32, 128], strides = [1, 1]} : vector<32x256xf32> to vector<32x128xf32>
    %c0_3 = arith.constant 0 : index
    %c0_4 = arith.constant 0 : index
    %5 = vector.load %arg5[%c0_3, %c0_4] : memref<32x32xf32, #tpu.memory_space<vmem>>, vector<32x32xf32>
    %cst_5 = arith.constant dense<0.000000e+00> : vector<32x128xf32>
    %6 = tpu.matmul %5, %3, %cst_5 {dimension_numbers = #tpu.dot_dimension_numbers<[1], [0], [0], [1], [0, 0, 1, 1], [], []>} : vector<32x32xf32>, vector<32x128xf32>, vector<32x128xf32> -> vector<32x128xf32>
    %7 = vector.extract_strided_slice %6 {offsets = [0, 0], sizes = [16, 128], strides = [1, 1]} : vector<32x128xf32> to vector<16x128xf32>
    %8 = vector.extract_strided_slice %6 {offsets = [16, 0], sizes = [16, 128], strides = [1, 1]} : vector<32x128xf32> to vector<16x128xf32>
    %c0_6 = arith.constant 0 : index
    %c0_7 = arith.constant 0 : index
    %9 = vector.load %arg6[%c0_6, %c0_7] : memref<16x32xf32, #tpu.memory_space<vmem>>, vector<16x32xf32>
    %cst_8 = arith.constant dense<0.000000e+00> : vector<16x128xf32>
    %10 = tpu.matmul %9, %4, %cst_8 {dimension_numbers = #tpu.dot_dimension_numbers<[1], [0], [0], [1], [0, 0, 1, 1], [], []>} : vector<16x32xf32>, vector<32x128xf32>, vector<16x128xf32> -> vector<16x128xf32>
    %11 = arith.addf %8, %10 : vector<16x128xf32>
    %c0_9 = arith.constant 0 : index
    %c0_10 = arith.constant 0 : index
    %12 = vector.load %arg2[%c0_9, %c0_10] : memref<16x128xf32, #tpu.memory_space<vmem>>, vector<16x128xf32>
    %c0_11 = arith.constant 0 : index
    %c0_12 = arith.constant 0 : index
    %13 = vector.load %arg3[%c0_11, %c0_12] : memref<16x128xf32, #tpu.memory_space<vmem>>, vector<16x128xf32>
    %14 = arith.mulf %12, %12 : vector<16x128xf32>
    %15 = arith.mulf %7, %7 : vector<16x128xf32>
    %16 = arith.mulf %12, %7 : vector<16x128xf32>
    %17 = arith.mulf %13, %13 : vector<16x128xf32>
    %18 = arith.mulf %11, %11 : vector<16x128xf32>
    %19 = arith.mulf %13, %11 : vector<16x128xf32>
    %c0_13 = arith.constant 0 : index
    %c0_14 = arith.constant 0 : index
    %20 = vector.load %arg10[%c0_13, %c0_14] : memref<160x128xf32, #tpu.memory_space<vmem>>, vector<16x128xf32>
    tpu.vector_store %arg10[%c0_13, %c0_14], %12 {strides = array<i32>} : memref<160x128xf32, #tpu.memory_space<vmem>>, vector<16x128xf32>,
    %c16 = arith.constant 16 : index
    %c0_15 = arith.constant 0 : index
    %21 = vector.load %arg10[%c16, %c0_15] : memref<160x128xf32, #tpu.memory_space<vmem>>, vector<16x128xf32>
    tpu.vector_store %arg10[%c16, %c0_15], %7 {strides = array<i32>} : memref<160x128xf32, #tpu.memory_space<vmem>>, vector<16x128xf32>,
    %c32 = arith.constant 32 : index
    %c0_16 = arith.constant 0 : index
    %22 = vector.load %arg10[%c32, %c0_16] : memref<160x128xf32, #tpu.memory_space<vmem>>, vector<16x128xf32>
    tpu.vector_store %arg10[%c32, %c0_16], %14 {strides = array<i32>} : memref<160x128xf32, #tpu.memory_space<vmem>>, vector<16x128xf32>,
    %c48 = arith.constant 48 : index
    %c0_17 = arith.constant 0 : index
    %23 = vector.load %arg10[%c48, %c0_17] : memref<160x128xf32, #tpu.memory_space<vmem>>, vector<16x128xf32>
    tpu.vector_store %arg10[%c48, %c0_17], %15 {strides = array<i32>} : memref<160x128xf32, #tpu.memory_space<vmem>>, vector<16x128xf32>,
    %c64 = arith.constant 64 : index
    %c0_18 = arith.constant 0 : index
    %24 = vector.load %arg10[%c64, %c0_18] : memref<160x128xf32, #tpu.memory_space<vmem>>, vector<16x128xf32>
    tpu.vector_store %arg10[%c64, %c0_18], %16 {strides = array<i32>} : memref<160x128xf32, #tpu.memory_space<vmem>>, vector<16x128xf32>,
    %c80 = arith.constant 80 : index
    %c0_19 = arith.constant 0 : index
    %25 = vector.load %arg10[%c80, %c0_19] : memref<160x128xf32, #tpu.memory_space<vmem>>, vector<16x128xf32>
    tpu.vector_store %arg10[%c80, %c0_19], %13 {strides = array<i32>} : memref<160x128xf32, #tpu.memory_space<vmem>>, vector<16x128xf32>,
    %c96 = arith.constant 96 : index
    %c0_20 = arith.constant 0 : index
    %26 = vector.load %arg10[%c96, %c0_20] : memref<160x128xf32, #tpu.memory_space<vmem>>, vector<16x128xf32>
    tpu.vector_store %arg10[%c96, %c0_20], %11 {strides = array<i32>} : memref<160x128xf32, #tpu.memory_space<vmem>>, vector<16x128xf32>,
    %c112 = arith.constant 112 : index
    %c0_21 = arith.constant 0 : index
    %27 = vector.load %arg10[%c112, %c0_21] : memref<160x128xf32, #tpu.memory_space<vmem>>, vector<16x128xf32>
    tpu.vector_store %arg10[%c112, %c0_21], %17 {strides = array<i32>} : memref<160x128xf32, #tpu.memory_space<vmem>>, vector<16x128xf32>,
    %c128 = arith.constant 128 : index
    %c0_22 = arith.constant 0 : index
    %28 = vector.load %arg10[%c128, %c0_22] : memref<160x128xf32, #tpu.memory_space<vmem>>, vector<16x128xf32>
    tpu.vector_store %arg10[%c128, %c0_22], %18 {strides = array<i32>} : memref<160x128xf32, #tpu.memory_space<vmem>>, vector<16x128xf32>,
    %c144 = arith.constant 144 : index
    %c0_23 = arith.constant 0 : index
    %29 = vector.load %arg10[%c144, %c0_23] : memref<160x128xf32, #tpu.memory_space<vmem>>, vector<16x128xf32>
    tpu.vector_store %arg10[%c144, %c0_23], %19 {strides = array<i32>} : memref<160x128xf32, #tpu.memory_space<vmem>>, vector<16x128xf32>,
    %c0_24 = arith.constant 0 : index
    %c0_25 = arith.constant 0 : index
    %30 = vector.load %arg10[%c0_24, %c0_25] : memref<160x128xf32, #tpu.memory_space<vmem>>, vector<160x128xf32>
    %c0_26 = arith.constant 0 : index
    %c0_27 = arith.constant 0 : index
    %31 = vector.load %arg7[%c0_26, %c0_27] : memref<128x128xf32, #tpu.memory_space<vmem>>, vector<128x128xf32>
    %cst_28 = arith.constant dense<0.000000e+00> : vector<160x128xf32>
    %32 = tpu.matmul %30, %31, %cst_28 {dimension_numbers = #tpu.dot_dimension_numbers<[1], [0], [0], [1], [0, 0, 1, 1], [], []>} : vector<160x128xf32>, vector<128x128xf32>, vector<160x128xf32> -> vector<160x128xf32>
    %c0_29 = arith.constant 0 : index
    %c0_30 = arith.constant 0 : index
    %33 = vector.load %arg8[%c0_29, %c0_30] : memref<160x160xf32, #tpu.memory_space<vmem>>, vector<160x160xf32>
    %cst_31 = arith.constant dense<0.000000e+00> : vector<160x128xf32>
    %34 = tpu.matmul %33, %32, %cst_31 {dimension_numbers = #tpu.dot_dimension_numbers<[1], [0], [0], [1], [0, 0, 1, 1], [], []>} : vector<160x160xf32>, vector<160x128xf32>, vector<160x128xf32> -> vector<160x128xf32>
    %35 = vector.extract_strided_slice %34 {offsets = [0, 0], sizes = [16, 128], strides = [1, 1]} : vector<160x128xf32> to vector<16x128xf32>
    %36 = vector.extract_strided_slice %34 {offsets = [16, 0], sizes = [16, 128], strides = [1, 1]} : vector<160x128xf32> to vector<16x128xf32>
    %37 = vector.extract_strided_slice %34 {offsets = [32, 0], sizes = [16, 128], strides = [1, 1]} : vector<160x128xf32> to vector<16x128xf32>
    %38 = vector.extract_strided_slice %34 {offsets = [48, 0], sizes = [16, 128], strides = [1, 1]} : vector<160x128xf32> to vector<16x128xf32>
    %39 = vector.extract_strided_slice %34 {offsets = [64, 0], sizes = [16, 128], strides = [1, 1]} : vector<160x128xf32> to vector<16x128xf32>
    %40 = arith.mulf %35, %35 : vector<16x128xf32>
    %41 = arith.mulf %36, %36 : vector<16x128xf32>
    %42 = arith.mulf %35, %36 : vector<16x128xf32>
    %cst_32 = arith.constant 2.000000e+00 : f32
    %43 = vector.broadcast %cst_32 : f32 to vector<16x128xf32>
    %44 = arith.mulf %43, %42 : vector<16x128xf32>
    %cst_33 = arith.constant 6.502500e+00 : f32
    %45 = vector.broadcast %cst_33 : f32 to vector<16x128xf32>
    %46 = arith.addf %44, %45 : vector<16x128xf32>
    %47 = arith.subf %39, %42 : vector<16x128xf32>
    %cst_34 = arith.constant 2.000000e+00 : f32
    %48 = vector.broadcast %cst_34 : f32 to vector<16x128xf32>
    %49 = arith.mulf %48, %47 : vector<16x128xf32>
    %cst_35 = arith.constant 5.852250e+01 : f32
    %50 = vector.broadcast %cst_35 : f32 to vector<16x128xf32>
    %51 = arith.addf %49, %50 : vector<16x128xf32>
    %52 = arith.mulf %46, %51 : vector<16x128xf32>
    %53 = arith.addf %40, %41 : vector<16x128xf32>
    %cst_36 = arith.constant 6.502500e+00 : f32
    %54 = vector.broadcast %cst_36 : f32 to vector<16x128xf32>
    %55 = arith.addf %53, %54 : vector<16x128xf32>
    %56 = arith.subf %37, %40 : vector<16x128xf32>
    %57 = arith.subf %38, %41 : vector<16x128xf32>
    %58 = arith.addf %56, %57 : vector<16x128xf32>
    %cst_37 = arith.constant 5.852250e+01 : f32
    %59 = vector.broadcast %cst_37 : f32 to vector<16x128xf32>
    %60 = arith.addf %58, %59 : vector<16x128xf32>
    %61 = arith.mulf %55, %60 : vector<16x128xf32>
    %62 = arith.divf %52, %61 : vector<16x128xf32>
    %cst_38 = arith.constant dense<0.000000e+00> : vector<128xf32>
    %63 = vector.multi_reduction <add>, %62, %cst_38 [0] : vector<16x128xf32> to vector<128xf32>
    %64 = vector.shape_cast %63 : vector<128xf32> to vector<1x128xf32>
    %65 = vector.extract_strided_slice %34 {offsets = [80, 0], sizes = [16, 128], strides = [1, 1]} : vector<160x128xf32> to vector<16x128xf32>
    %66 = vector.extract_strided_slice %34 {offsets = [96, 0], sizes = [16, 128], strides = [1, 1]} : vector<160x128xf32> to vector<16x128xf32>
    %67 = vector.extract_strided_slice %34 {offsets = [112, 0], sizes = [16, 128], strides = [1, 1]} : vector<160x128xf32> to vector<16x128xf32>
    %68 = vector.extract_strided_slice %34 {offsets = [128, 0], sizes = [16, 128], strides = [1, 1]} : vector<160x128xf32> to vector<16x128xf32>
    %69 = vector.extract_strided_slice %34 {offsets = [144, 0], sizes = [16, 128], strides = [1, 1]} : vector<160x128xf32> to vector<16x128xf32>
    %70 = arith.mulf %65, %65 : vector<16x128xf32>
    %71 = arith.mulf %66, %66 : vector<16x128xf32>
    %72 = arith.mulf %65, %66 : vector<16x128xf32>
    %cst_39 = arith.constant 2.000000e+00 : f32
    %73 = vector.broadcast %cst_39 : f32 to vector<16x128xf32>
    %74 = arith.mulf %73, %72 : vector<16x128xf32>
    %cst_40 = arith.constant 6.502500e+00 : f32
    %75 = vector.broadcast %cst_40 : f32 to vector<16x128xf32>
    %76 = arith.addf %74, %75 : vector<16x128xf32>
    %77 = arith.subf %69, %72 : vector<16x128xf32>
    %cst_41 = arith.constant 2.000000e+00 : f32
    %78 = vector.broadcast %cst_41 : f32 to vector<16x128xf32>
    %79 = arith.mulf %78, %77 : vector<16x128xf32>
    %cst_42 = arith.constant 5.852250e+01 : f32
    %80 = vector.broadcast %cst_42 : f32 to vector<16x128xf32>
    %81 = arith.addf %79, %80 : vector<16x128xf32>
    %82 = arith.mulf %76, %81 : vector<16x128xf32>
    %83 = arith.addf %70, %71 : vector<16x128xf32>
    %cst_43 = arith.constant 6.502500e+00 : f32
    %84 = vector.broadcast %cst_43 : f32 to vector<16x128xf32>
    %85 = arith.addf %83, %84 : vector<16x128xf32>
    %86 = arith.subf %67, %70 : vector<16x128xf32>
    %87 = arith.subf %68, %71 : vector<16x128xf32>
    %88 = arith.addf %86, %87 : vector<16x128xf32>
    %cst_44 = arith.constant 5.852250e+01 : f32
    %89 = vector.broadcast %cst_44 : f32 to vector<16x128xf32>
    %90 = arith.addf %88, %89 : vector<16x128xf32>
    %91 = arith.mulf %85, %90 : vector<16x128xf32>
    %92 = arith.divf %82, %91 : vector<16x128xf32>
    %cst_45 = arith.constant dense<0.000000e+00> : vector<128xf32>
    %93 = vector.multi_reduction <add>, %92, %cst_45 [0] : vector<16x128xf32> to vector<128xf32>
    %94 = vector.shape_cast %93 : vector<128xf32> to vector<1x128xf32>
    %95 = tpu.concatenate %64, %94 in 0 : vector<1x128xf32>, vector<1x128xf32> -> vector<2x128xf32>
    %96 = vector.shape_cast %95 : vector<2x128xf32> to vector<1x2x128xf32>
    %c0_46 = arith.constant 0 : index
    %c0_47 = arith.constant 0 : index
    %c0_48 = arith.constant 0 : index
    %97 = vector.load %arg9[%c0_46, %c0_47, %c0_48] : memref<1x2x128xf32, #tpu.memory_space<vmem>>, vector<1x2x128xf32>
    tpu.vector_store %arg9[%c0_46, %c0_47, %c0_48], %96 {strides = array<i32>} : memref<1x2x128xf32, #tpu.memory_space<vmem>>, vector<1x2x128xf32>,
    return
  }
  func.func @transform_0(%arg0: i32) -> (i32, i32) {
    %c0_i32 = arith.constant 0 : i32
    %c0_i32_0 = arith.constant 0 : i32
    return %c0_i32, %arg0 : i32, i32
  }
  func.func @transform_1(%arg0: i32) -> (i32, i32) {
    %c0_i32 = arith.constant 0 : i32
    %c0_i32_0 = arith.constant 0 : i32
    return %c0_i32, %arg0 : i32, i32
  }
  func.func @transform_2(%arg0: i32) -> (i32, i32) {
    %c0_i32 = arith.constant 0 : i32
    %c0_i32_0 = arith.constant 0 : i32
    return %c0_i32, %arg0 : i32, i32
  }
  func.func @transform_3(%arg0: i32) -> (i32, i32) {
    %c0_i32 = arith.constant 0 : i32
    %c0_i32_0 = arith.constant 0 : i32
    %c0_i32_1 = arith.constant 0 : i32
    return %c0_i32, %c0_i32_0 : i32, i32
  }
  func.func @transform_4(%arg0: i32) -> (i32, i32) {
    %c0_i32 = arith.constant 0 : i32
    %c0_i32_0 = arith.constant 0 : i32
    %c0_i32_1 = arith.constant 0 : i32
    return %c0_i32, %c0_i32_0 : i32, i32
  }
  func.func @transform_5(%arg0: i32) -> (i32, i32) {
    %c0_i32 = arith.constant 0 : i32
    %c0_i32_0 = arith.constant 0 : i32
    %c0_i32_1 = arith.constant 0 : i32
    return %c0_i32, %c0_i32_0 : i32, i32
  }
  func.func @transform_6(%arg0: i32) -> (i32, i32) {
    %c0_i32 = arith.constant 0 : i32
    %c0_i32_0 = arith.constant 0 : i32
    %c0_i32_1 = arith.constant 0 : i32
    return %c0_i32, %c0_i32_0 : i32, i32
  }
  func.func @transform_7(%arg0: i32) -> (i32, i32) {
    %c0_i32 = arith.constant 0 : i32
    %c0_i32_0 = arith.constant 0 : i32
    %c0_i32_1 = arith.constant 0 : i32
    return %c0_i32, %c0_i32_0 : i32, i32
  }
  func.func @transform_8(%arg0: i32) -> (i32, i32, i32) {
    %c0_i32 = arith.constant 0 : i32
    %c0_i32_0 = arith.constant 0 : i32
    %c0_i32_1 = arith.constant 0 : i32
    return %arg0, %c0_i32, %c0_i32_0 : i32, i32, i32
  }
}

</mosaic_0001>

<bundles_post_ra>
// kernel: frequent_loss.1
= control target key start
LH: loop header
LB: loop body
LE: loop exit
PB: predicated region body
PF: predicated region fallthrough
CT: control target
= control target key end

     0   :  { %vm194_vm0 = vcmask 261120   ;;  %vm965_vm1 = vcmask 1040384   ;;  %s1793_s3 = inlined_call_operand.vmem [shape: f32[256,256], index: 3, kind: input, shape index: {}]   ;;  %s1794_s0 = inlined_call_operand.vmem [shape: f32[32,256], index: 0, kind: input, shape index: {}]   ;;  %s1795_s4 = inlined_call_operand.vmem [shape: f32[32,32], index: 4, kind: input, shape index: {}]   ;;  %s1796_s6 = inlined_call_operand.vmem [shape: f32[128,128], index: 6, kind: input, shape index: {}]   ;;  %s1797_s1 = inlined_call_operand.vmem [shape: f32[16,128], index: 1, kind: input, shape index: {}]   ;;  %s1798_s5 = inlined_call_operand.vmem [shape: f32[16,32], index: 5, kind: input, shape index: {}]   ;;  %s1799_s2 = inlined_call_operand.vmem [shape: f32[16,128], index: 2, kind: input, shape index: {}]   ;;  %s1800_s7 = inlined_call_operand.vmem [shape: f32[160,160], index: 7, kind: input, shape index: {}]   ;;  %s1801_s8 = inlined_call_operand.vmem [shape: f32[1,2,128], index: 8, kind: output, shape index: {}]  }
   0x1   :  { %v38_v0 = vld [vmem:[%s1793_s3 + $0x8] sm:$0xff]  ;;  %v40_v1 = vld [vmem:[%s1793_s3 + $0x18] sm:$0xff]  ;;  %v37_v2 = vld [vmem:[%s1793_s3] sm:$0xff] }
   0x2   :  { %v1135_v3 = vpack.c.bf16 %v40_v1, %v38_v0  ;;  %v39_v4 = vld [vmem:[%s1793_s3 + $0x10] sm:$0xff]  ;;  %v42_v5 = vld [vmem:[%s1793_s3 + $0x28] sm:$0xff]  ;;  %v44_v6 = vld [vmem:[%s1793_s3 + $0x38] sm:$0xff] }
   0x3   :  { %v1137_v7 = vpack.c.bf16 %v39_v4, %v37_v2  ;;  %v1139_v8 = vpack.c.bf16 %v44_v6, %v42_v5  ;;  %v41_v9 = vld [vmem:[%s1793_s3 + $0x20] sm:$0xff]  ;;  %v43_v10 = vld [vmem:[%s1793_s3 + $0x30] sm:$0xff]  ;;  %v46_v11 = vld [vmem:[%s1793_s3 + $0x48] sm:$0xff] }
   0x4   :  { %1136 = vmatprep.subr.bf16.mxu0 %v1135_v3  ;;  %v48_v12 = vld [vmem:[%s1793_s3 + $0x58] sm:$0xff]  ;;  %v1141_v13 = vpack.c.bf16 %v43_v10, %v41_v9  ;;  %v45_v15 = vld [vmem:[%s1793_s3 + $0x40] sm:$0xff]  ;;  %v47_v16 = vld [vmem:[%s1793_s3 + $0x50] sm:$0xff] }
   0x5   :  { %1138 = vmatpush1.bf16.msra.mxu0 %v1137_v7  ;;  %v1143_v14 = vpack.c.bf16 %v48_v12, %v46_v11  ;;  %v50_v17 = vld [vmem:[%s1793_s3 + $0x68] sm:$0xff]  ;;  %v52_v18 = vld [vmem:[%s1793_s3 + $0x78] sm:$0xff]  ;;  %v1145_v19 = vpack.c.bf16 %v47_v16, %v45_v15  ;;  %v49_v21 = vld [vmem:[%s1793_s3 + $0x60] sm:$0xff] }
   0x6   :  { %1140 = vmatprep.subr.bf16.mxu0 %v1139_v8  ;;  %v1147_v20 = vpack.c.bf16 %v52_v18, %v50_v17  ;;  %v51_v22 = vld [vmem:[%s1793_s3 + $0x70] sm:$0xff]  ;;  %v54_v23 = vld [vmem:[%s1793_s3 + $0x88] sm:$0xff]  ;;  %v56_v24 = vld [vmem:[%s1793_s3 + $0x98] sm:$0xff] }
   0x7   :  { %v1149_v25 = vpack.c.bf16 %v51_v22, %v49_v21  ;;  %v1151_v26 = vpack.c.bf16 %v56_v24, %v54_v23  ;;  %v53_v27 = vld [vmem:[%s1793_s3 + $0x80] sm:$0xff]  ;;  %v55_v28 = vld [vmem:[%s1793_s3 + $0x90] sm:$0xff]  ;;  %v58_v29 = vld [vmem:[%s1793_s3 + $0xa8] sm:$0xff] }
   0x8   :  { %v60_v30 = vld [vmem:[%s1793_s3 + $0xb8] sm:$0xff]  ;;  %v1153_v31 = vpack.c.bf16 %v55_v28, %v53_v27  ;;  %v57_v33 = vld [vmem:[%s1793_s3 + $0xa0] sm:$0xff]  ;;  %v59_v34 = vld [vmem:[%s1793_s3 + $0xb0] sm:$0xff] }
   0x9   :  { %1142 = vmatpush1.bf16.msra.mxu0 %v1141_v13  ;;  %v1155_v32 = vpack.c.bf16 %v60_v30, %v58_v29  ;;  %v62_v35 = vld [vmem:[%s1793_s3 + $0xc8] sm:$0xff]  ;;  %v64_v36 = vld [vmem:[%s1793_s3 + $0xd8] sm:$0xff]  ;;  %v1157_v37 = vpack.c.bf16 %v59_v34, %v57_v33  ;;  %v61_v39 = vld [vmem:[%s1793_s3 + $0xc0] sm:$0xff] }
   0xa   :  { %1144 = vmatprep.subr.bf16.mxu0 %v1143_v14  ;;  %v1159_v38 = vpack.c.bf16 %v64_v36, %v62_v35  ;;  %v63_v40 = vld [vmem:[%s1793_s3 + $0xd0] sm:$0xff]  ;;  %v30_v41 = vld [vmem:[%s1794_s0 + $0x8] sm:$0xff]  ;;  %v68_v43 = vld [vmem:[%s1793_s3 + $0xf8] sm:$0xff] }
   0xb   :  { %v66_v42 = vld [vmem:[%s1793_s3 + $0xe8] sm:$0xff]  ;;  %165 = vmatprep.mubr.f32.mxu0 %v30_v41  ;;  %v1161_v44 = vpack.c.bf16 %v63_v40, %v61_v39  ;;  %v65_v46 = vld [vmem:[%s1793_s3 + $0xe0] sm:$0xff]  ;;  %v67_v47 = vld [vmem:[%s1793_s3 + $0xf0] sm:$0xff] }
   0xc   :  { %v1163_v45 = vpack.c.bf16 %v68_v43, %v66_v42  ;;  %v70_v48 = vld [vmem:[%s1793_s3 + $0x108] sm:$0xff]  ;;  %v72_v49 = vld [vmem:[%s1793_s3 + $0x118] sm:$0xff]  ;;  %v1165_v50 = vpack.c.bf16 %v67_v47, %v65_v46  ;;  %v69_v52 = vld [vmem:[%s1793_s3 + $0x100] sm:$0xff] }
   0xd   :  { %1146 = vmatpush1.bf16.msra.mxu0 %v1145_v19  ;;  %v1167_v51 = vpack.c.bf16 %v72_v49, %v70_v48  ;;  %v71_v53 = vld [vmem:[%s1793_s3 + $0x110] sm:$0xff]  ;;  %v74_v54 = vld [vmem:[%s1793_s3 + $0x128] sm:$0xff]  ;;  %v76_v55 = vld [vmem:[%s1793_s3 + $0x138] sm:$0xff] }
   0xe   :  { %1148 = vmatprep.subr.bf16.mxu0 %v1147_v20  ;;  %v1169_v56 = vpack.c.bf16 %v71_v53, %v69_v52  ;;  %v1171_v57 = vpack.c.bf16 %v76_v55, %v74_v54  ;;  %v73_v58 = vld [vmem:[%s1793_s3 + $0x120] sm:$0xff]  ;;  %v75_v59 = vld [vmem:[%s1793_s3 + $0x130] sm:$0xff]  ;;  %v78_v60 = vld [vmem:[%s1793_s3 + $0x148] sm:$0xff] }
   0xf   :  { %v80_v61 = vld [vmem:[%s1793_s3 + $0x158] sm:$0xff]  ;;  %v1173_v62 = vpack.c.bf16 %v75_v59, %v73_v58  ;;  %v77_v0 = vld [vmem:[%s1793_s3 + $0x140] sm:$0xff]  ;;  %v79_v1 = vld [vmem:[%s1793_s3 + $0x150] sm:$0xff] }
  0x10   :  { %v1175_v63 = vpack.c.bf16 %v80_v61, %v78_v60  ;;  %v82_v2 = vld [vmem:[%s1793_s3 + $0x168] sm:$0xff]  ;;  %v84_v3 = vld [vmem:[%s1793_s3 + $0x178] sm:$0xff]  ;;  %v1177_v4 = vpack.c.bf16 %v79_v1, %v77_v0  ;;  %v81_v6 = vld [vmem:[%s1793_s3 + $0x160] sm:$0xff] }
  0x11   :  { %1150 = vmatpush1.bf16.msra.mxu0 %v1149_v25  ;;  %v1179_v5 = vpack.c.bf16 %v84_v3, %v82_v2  ;;  %v83_v7 = vld [vmem:[%s1793_s3 + $0x170] sm:$0xff]  ;;  %v86_v8 = vld [vmem:[%s1793_s3 + $0x188] sm:$0xff]  ;;  %v88_v9 = vld [vmem:[%s1793_s3 + $0x198] sm:$0xff] }
  0x12   :  { %1152 = vmatprep.subr.bf16.mxu0 %v1151_v26  ;;  %v1181_v10 = vpack.c.bf16 %v83_v7, %v81_v6  ;;  %v1183_v11 = vpack.c.bf16 %v88_v9, %v86_v8  ;;  %v85_v12 = vld [vmem:[%s1793_s3 + $0x180] sm:$0xff]  ;;  %v87_v13 = vld [vmem:[%s1793_s3 + $0x190] sm:$0xff]  ;;  %v90_v14 = vld [vmem:[%s1793_s3 + $0x1a8] sm:$0xff] }
  0x13   :  { %v92_v15 = vld [vmem:[%s1793_s3 + $0x1b8] sm:$0xff]  ;;  %v1185_v16 = vpack.c.bf16 %v87_v13, %v85_v12  ;;  %v89_v18 = vld [vmem:[%s1793_s3 + $0x1a0] sm:$0xff]  ;;  %v91_v19 = vld [vmem:[%s1793_s3 + $0x1b0] sm:$0xff] }
  0x14   :  { %v1187_v17 = vpack.c.bf16 %v92_v15, %v90_v14  ;;  %v94_v20 = vld [vmem:[%s1793_s3 + $0x1c8] sm:$0xff]  ;;  %v96_v21 = vld [vmem:[%s1793_s3 + $0x1d8] sm:$0xff]  ;;  %v1189_v22 = vpack.c.bf16 %v91_v19, %v89_v18  ;;  %v93_v24 = vld [vmem:[%s1793_s3 + $0x1c0] sm:$0xff] }
  0x15   :  { %1154 = vmatpush1.bf16.msra.mxu0 %v1153_v31  ;;  %v1191_v23 = vpack.c.bf16 %v96_v21, %v94_v20  ;;  %v95_v25 = vld [vmem:[%s1793_s3 + $0x1d0] sm:$0xff]  ;;  %v98_v26 = vld [vmem:[%s1793_s3 + $0x1e8] sm:$0xff]  ;;  %v100_v27 = vld [vmem:[%s1793_s3 + $0x1f8] sm:$0xff]  ;;  %v1288_v20 = vmov 0.0|0.0  }
  0x16   :  { %1156 = vmatprep.subr.bf16.mxu0 %v1155_v32  ;;  %v1193_v28 = vpack.c.bf16 %v95_v25, %v93_v24  ;;  %v1195_v29 = vpack.c.bf16 %v100_v27, %v98_v26  ;;  %v97_v30 = vld [vmem:[%s1793_s3 + $0x1e0] sm:$0xff]  ;;  %v99_v31 = vld [vmem:[%s1793_s3 + $0x1f0] sm:$0xff]  ;;  %v32_v34 = vld [vmem:[%s1794_s0 + $0x18] sm:$0xff] }
  0x17   :  { %v1197_v32 = vpack.c.bf16 %v99_v31, %v97_v30  ;;  %v29_v33 = vld [vmem:[%s1794_s0] sm:$0xff]  ;;  %v31_v35 = vld [vmem:[%s1794_s0 + $0x10] sm:$0xff]  ;;  %v34_v36 = vld [vmem:[%s1794_s0 + $0x28] sm:$0xff] }
  0x18   :  { %v35_v39 = vld [vmem:[%s1794_s0 + $0x30] sm:$0xff]  ;;  %v190_v40 = vld [vmem:[%s1795_s4] sm:$0xff]  ;;  %v434_v42 = vld [vmem:[%s1796_s6 + $0x8] sm:$0xff] }
  0x19   :  { %1158 = vmatpush1.bf16.msra.mxu0 %v1157_v37  ;;  %v33_v37 = vld [vmem:[%s1794_s0 + $0x20] sm:$0xff]  ;;  %1056 = vmatprep.mubr.msk.f32.mxu1 %vm194_vm0, %v190_v40  ;;  %v435_v43 = vld [vmem:[%s1796_s6 + $0x10] sm:$0xff]  ;;  %v438_v48 = vld [vmem:[%s1796_s6 + $0x28] sm:$0xff] }
  0x1a   :  { %1160 = vmatprep.subr.bf16.mxu0 %v1159_v38  ;;  %v36_v38 = vld [vmem:[%s1794_s0 + $0x38] sm:$0xff]  ;;  %v433_v41 = vld [vmem:[%s1796_s6] sm:$0xff]  ;;  %v442_v55 = vld [vmem:[%s1796_s6 + $0x48] sm:$0xff] }
  0x1b   :  { %v437_v47 = vld [vmem:[%s1796_s6 + $0x20] sm:$0xff]  ;;  %v440_v52 = vld [vmem:[%s1796_s6 + $0x38] sm:$0xff]  ;;  %v446_v61 = vld [vmem:[%s1796_s6 + $0x68] sm:$0xff] }
  0x1c   :  { %v1223_v49 = vpack.c.bf16 %v438_v48, %v437_v47  ;;  %v441_v54 = vld [vmem:[%s1796_s6 + $0x40] sm:$0xff]  ;;  %v444_v58 = vld [vmem:[%s1796_s6 + $0x58] sm:$0xff]  ;;  %v378_v2 = vld [vmem:[%s1797_s1 + $0x8] sm:$0xff] }
  0x1d   :  { %1162 = vmatpush1.bf16.msra.mxu0 %v1161_v44  ;;  %v1215_v44 = vpack.c.bf16 %v434_v42, %v433_v41  ;;  %v445_v60 = vld [vmem:[%s1796_s6 + $0x60] sm:$0xff]  ;;  %v448_v0 = vld [vmem:[%s1796_s6 + $0x78] sm:$0xff]  ;;  %v191_v15 = vld [vmem:[%s1795_s4 + $0x8] sm:$0xff]  ;;  %v382_v27 = vmul.f32 %v378_v2, %v378_v2 }
  0x1e   :  { %1164 = vmatprep.subr.bf16.mxu0 %v1163_v45  ;;  %v436_v45 = vld [vmem:[%s1796_s6 + $0x18] sm:$0xff]  ;;  %v292_v18 = vld [vmem:[%s1798_s5] sm:$0xff]  ;;  %v293_v19 = vld [vmem:[%s1798_s5 + $0x8] sm:$0xff] }
  0x1f   :  { %v1219_v46 = vpack.c.bf16 %v436_v45, %v435_v43  ;;  %v615_v42 = vld [vmem:[%s1800_s7 + $0x8] sm:$0xff] }
  0x21   :  { %1166 = vmatpush1.bf16.msra.mxu0 %v1165_v50  ;;  %v1575_v50 = vld [vmem:[%s1797_s1] sm:$0xff] }
  0x22   :  { %1168 = vmatprep.subr.bf16.mxu0 %v1167_v51  ;;  %v439_v51 = vld [vmem:[%s1796_s6 + $0x30] sm:$0xff]  ;;  %v381_v25 = vmul.f32 %v1575_v50, %v1575_v50 }
  0x23   :  { %v1227_v53 = vpack.c.bf16 %v440_v52, %v439_v51 }
  0x25   :  { %1170 = vmatpush1.bf16.msra.mxu0 %v1169_v56  ;;  %v1231_v56 = vpack.c.bf16 %v442_v55, %v441_v54 }
  0x26   :  { %1172 = vmatprep.subr.bf16.mxu0 %v1171_v57  ;;  %v443_v57 = vld [vmem:[%s1796_s6 + $0x50] sm:$0xff] }
  0x27   :  { %v1235_v59 = vpack.c.bf16 %v444_v58, %v443_v57 }
  0x29   :  { %1174 = vmatpush1.bf16.msra.mxu0 %v1173_v62  ;;  %v1239_v62 = vpack.c.bf16 %v446_v61, %v445_v60 }
  0x2a   :  { %1176 = vmatprep.subr.bf16.mxu0 %v1175_v63  ;;  %v447_v63 = vld [vmem:[%s1796_s6 + $0x70] sm:$0xff] }
  0x2b   :  { %v1243_v1 = vpack.c.bf16 %v448_v0, %v447_v63 }
  0x2d   :  { %1178 = vmatpush1.bf16.msra.mxu0 %v1177_v4 }
  0x2e   :  { %1180 = vmatprep.subr.bf16.mxu0 %v1179_v5 }
  0x31   :  { %1182 = vmatpush1.bf16.msra.mxu0 %v1181_v10 }
  0x32   :  { %1184 = vmatprep.subr.bf16.mxu0 %v1183_v11 }
  0x35   :  { %1186 = vmatpush1.bf16.msra.mxu0 %v1185_v16  ;;  %v192_v16 = vld [vmem:[%s1795_s4 + $0x10] sm:$0xff] }
  0x36   :  { %1188 = vmatprep.subr.bf16.mxu0 %v1187_v17  ;;  %v193_v17 = vld [vmem:[%s1795_s4 + $0x18] sm:$0xff] }
  0x39   :  { %1190 = vmatpush1.bf16.msra.mxu0 %v1189_v22 }
  0x3a   :  { %1192 = vmatprep.subr.bf16.mxu0 %v1191_v23 }
  0x3d   :  { %1194 = vmatpush1.bf16.msra.mxu0 %v1193_v28 }
  0x3e   :  { %1196 = vmatprep.subr.bf16.mxu0 %v1195_v29 }
  0x41   :  { %1198 = vmatpush1.bf16.msra.mxu0 %v1197_v32 }
  0x42   :  { %1216 = vmatprep.subr.bf16.mxu0 %v1215_v44 }
  0x44   :  { %166 = vmatmul.mubr.f32.vlgmr.msra.gmra.mrb[0].mxu0 %v29_v33 }
  0x45   :  { %171 = vmatprep.mubr.f32.mxu0 %v32_v34  ;;  %1218 = vmatpush3.bf16.msra.mxu0 %v1215_v44  ;;  %v379_v34 = vld [vmem:[%s1799_s2] sm:$0xff] }
  0x46   :  { %1220 = vmatprep.subr.bf16.mxu0 %v1219_v46 }
  0x48   :  { %172 = vmatmul.mubr.f32.gmra.mrb[2].mxu0 %v31_v35  ;;  %v380_v35 = vld [vmem:[%s1799_s2 + $0x8] sm:$0xff] }
  0x49   :  { %177 = vmatprep.mubr.f32.mxu0 %v34_v36  ;;  %1222 = vmatpush3.bf16.msra.mxu0 %v1219_v46  ;;  %v387_v36 = vmul.f32 %v379_v34, %v379_v34 }
  0x4a   :  { %1224 = vmatprep.subr.bf16.mxu0 %v1223_v49 }
  0x4c   :  { %178 = vmatmul.mubr.f32.gmra.mrb[4].mxu0 %v33_v37  ;;  %v388_v37 = vmul.f32 %v380_v35, %v380_v35 }
  0x4d   :  { %183 = vmatprep.mubr.f32.mxu0 %v36_v38  ;;  %1226 = vmatpush3.bf16.msra.mxu0 %v1223_v49 }
  0x4e   :  { %1228 = vmatprep.subr.bf16.mxu0 %v1227_v53 }
  0x50   :  { %184 = vmatmul.mubr.f32.gmra.mrb[6].mxu0 %v35_v39 }
  0x51   :  { %1105 = vmatprep.mubr.f32.mxu0 %v1575_v50  ;;  %1230 = vmatpush3.bf16.msra.mxu0 %v1227_v53 }
  0x52   :  { %1232 = vmatprep.subr.bf16.mxu0 %v1231_v56 }
  0x55   :  { %1234 = vmatpush3.bf16.msra.mxu0 %v1231_v56 }
  0x56   :  { %1236 = vmatprep.subr.bf16.mxu0 %v1235_v59 }
  0x59   :  { %1238 = vmatpush3.bf16.msra.mxu0 %v1235_v59 }
  0x5a   :  { %1240 = vmatprep.subr.bf16.mxu0 %v1239_v62 }
  0x5d   :  { %1242 = vmatpush3.bf16.msra.mxu0 %v1239_v62 }
  0x5e   :  { %1244 = vmatprep.subr.bf16.mxu0 %v1243_v1 }
  0x61   :  { %1246 = vmatpush3.bf16.msra.mxu0 %v1243_v1 }
  0x64   :  { %1106 = vmatmul.mubr.f32.vlgmr.msra.gmra.mrb[8].mxu0 %v378_v2 }
 0x117   :  { %v167_v3 = vpop.f32.mrb[0].mxu0 }
 0x118   :  { %v169_v4 = vpop.f32.mrb[1].mxu0 }
 0x11b   :  { %v173_v5 = vpop.f32.mrb[2].mxu0 }
 0x11c   :  { %v1199_v6 = vpack.c.bf16 %v173_v5, %v167_v3  ;;  %v175_v7 = vpop.f32.mrb[3].mxu0 }
 0x11d   :  { %v1207_v8 = vpack.c.bf16 %v175_v7, %v169_v4  ;;  %v617_v7 = vld [vmem:[%s1800_s7 + $0x18] sm:$0xff] }
 0x11e   :  { %1200 = vmatprep.subr.bf16.mxu1 %v1199_v6 }
 0x11f   :  { %v179_v9 = vpop.f32.mrb[4].mxu0  ;;  %1202 = vmatpush3.bf16.msra.mxu1 %v1199_v6  ;;  %v614_v6 = vld [vmem:[%s1800_s7] sm:$0xff] }
 0x120   :  { %v181_v10 = vpop.f32.mrb[5].mxu0 }
 0x123   :  { %v185_v11 = vpop.f32.mrb[6].mxu0 }
 0x124   :  { %v1203_v12 = vpack.c.bf16 %v185_v11, %v179_v9  ;;  %v187_v13 = vpop.f32.mrb[7].mxu0  ;;  %v619_v9 = vld [vmem:[%s1800_s7 + $0x28] sm:$0xff]  ;;  %v621_v11 = vld [vmem:[%s1800_s7 + $0x38] sm:$0xff] }
 0x125   :  { %v1211_v14 = vpack.c.bf16 %v187_v13, %v181_v10  ;;  %v618_v10 = vld [vmem:[%s1800_s7 + $0x20] sm:$0xff]  ;;  %v623_v13 = vld [vmem:[%s1800_s7 + $0x48] sm:$0xff] }
 0x126   :  { %1204 = vmatprep.subr.bf16.mxu1 %v1203_v12 }
 0x127   :  { %1206 = vmatpush3.bf16.msra.mxu1 %v1203_v12  ;;  %v620_v12 = vld [vmem:[%s1800_s7 + $0x30] sm:$0xff] }
 0x128   :  { %1208 = vmatprep.subr.bf16.mxu1 %v1207_v8 }
 0x12a   :  { %1057 = vmatmul.mubr.msk.f32.vlgmr.msra.gmra.mrb[0].mxu1 %vm194_vm0, %v191_v15  ;;  %v625_v15 = vld [vmem:[%s1800_s7 + $0x58] sm:$0xff] }
 0x12b   :  { %1210 = vmatpush3.bf16.msra.mxu1 %v1207_v8  ;;  %1059 = vmatprep.mubr.msk.f32.mxu1 %vm194_vm0, %v192_v16  ;;  %v616_v8 = vld [vmem:[%s1800_s7 + $0x10] sm:$0xff] }
 0x12c   :  { %1212 = vmatprep.subr.bf16.mxu1 %v1211_v14  ;;  %v624_v16 = vld [vmem:[%s1800_s7 + $0x50] sm:$0xff] }
 0x12e   :  { %1060 = vmatmul.mubr.msk.f32.gmra.mrb[2].mxu1 %vm194_vm0, %v193_v17  ;;  %v627_v17 = vld [vmem:[%s1800_s7 + $0x68] sm:$0xff] }
 0x12f   :  { %1214 = vmatpush3.bf16.msra.mxu1 %v1211_v14  ;;  %1070 = vmatprep.mubr.msk.f32.mxu1 %vm194_vm0, %v292_v18  ;;  %v622_v14 = vld [vmem:[%s1800_s7 + $0x40] sm:$0xff] }
 0x130   :  { %1247 = vmatprep.subr.bf16.mxu1 %v1288_v20  ;;  %v626_v18 = vld [vmem:[%s1800_s7 + $0x60] sm:$0xff] }
 0x136   :  { %1071 = vmatmul.mubr.msk.f32.vlgmr.msra.gmra.mrb[2].mxu1 %vm194_vm0, %v293_v19  ;;  %v629_v19 = vld [vmem:[%s1800_s7 + $0x78] sm:$0xff] }
 0x137   :  { %v1107_v21 = vpop.f32.mrb[8].mxu0  ;;  %978 = vmatprep.mubr.msk.f32.mxu1 %vm194_vm0, %v615_v42  ;;  %v650_v42 = vld [vmem:[%s1800_s7 + $0x120] sm:$0xff] }
 0x138   :  { %v515_v22 = vpop.f32.mrb[9].mxu0 }
 0x139   :  { %v1248_v23 = vpack.c.bf16 %v1107_v21, %v515_v22  ;;  %v631_v21 = vld [vmem:[%s1800_s7 + $0x88] sm:$0xff]  ;;  %v630_v22 = vld [vmem:[%s1800_s7 + $0x80] sm:$0xff] }
 0x13b   :  { %1249 = vmatpush1.bf16.msra.mxu1 %v1248_v23  ;;  %v633_v23 = vld [vmem:[%s1800_s7 + $0x98] sm:$0xff] }
 0x13c   :  { %1250 = vmatprep.subr.bf16.mxu1 %v1288_v20 }
 0x1fd   :  { %v1058_v24 = vpop.f32.mrb[0].mxu1 }
 0x1fe   :  { %v273_v26 = vpop.f32.mrb[1].mxu1  ;;  %v384_v29 = vmul.f32 %v1058_v24, %v1058_v24  ;;  %v386_v32 = vmul.f32 %v1058_v24, %v378_v2 }
 0x1ff   :  { %1108 = vmatprep.mubr.f32.mxu0 %v273_v26  ;;  %v383_v28 = vmul.f32 %v273_v26, %v273_v26  ;;  %v385_v30 = vmul.f32 %v1575_v50, %v273_v26  ;;  %v634_v26 = vld [vmem:[%s1800_s7 + $0xa0] sm:$0xff] }
 0x200   :  { %1109 = vmatmul.mubr.f32.gmra.mrb[10].mxu0 %v1058_v24  ;;  %v632_v24 = vld [vmem:[%s1800_s7 + $0x90] sm:$0xff] }
 0x201   :  { %1111 = vmatprep.mubr.f32.mxu0 %v381_v25  ;;  %v635_v25 = vld [vmem:[%s1800_s7 + $0xa8] sm:$0xff] }
 0x204   :  { %1112 = vmatmul.mubr.f32.gmra.mrb[12].mxu0 %v382_v27  ;;  %v637_v27 = vld [vmem:[%s1800_s7 + $0xb8] sm:$0xff] }
 0x205   :  { %1114 = vmatprep.mubr.f32.mxu0 %v383_v28  ;;  %v636_v28 = vld [vmem:[%s1800_s7 + $0xb0] sm:$0xff] }
 0x208   :  { %1115 = vmatmul.mubr.f32.gmra.mrb[14].mxu0 %v384_v29  ;;  %v639_v29 = vld [vmem:[%s1800_s7 + $0xc8] sm:$0xff] }
 0x209   :  { %v1072_v31 = vpop.f32.mrb[2].mxu1  ;;  %1117 = vmatprep.mubr.f32.mxu0 %v385_v30  ;;  %v638_v30 = vld [vmem:[%s1800_s7 + $0xc0] sm:$0xff] }
 0x20a   :  { %v366_v33 = vpop.f32.mrb[3].mxu1  ;;  %v390_v39 = vmul.f32 %v1072_v31, %v1072_v31  ;;  %v392_v41 = vmul.f32 %v1072_v31, %v380_v35 }
 0x20b   :  { %v389_v38 = vmul.f32 %v366_v33, %v366_v33  ;;  %v391_v40 = vmul.f32 %v379_v34, %v366_v33 }
 0x20c   :  { %1118 = vmatmul.mubr.f32.gmra.mrb[16].mxu0 %v386_v32  ;;  %v640_v32 = vld [vmem:[%s1800_s7 + $0xd0] sm:$0xff] }
 0x20d   :  { %1120 = vmatprep.mubr.f32.mxu0 %v379_v34  ;;  %v642_v34 = vld [vmem:[%s1800_s7 + $0xe0] sm:$0xff] }
 0x210   :  { %1121 = vmatmul.mubr.f32.gmra.mrb[18].mxu0 %v380_v35  ;;  %v645_v35 = vld [vmem:[%s1800_s7 + $0xf8] sm:$0xff] }
 0x211   :  { %1123 = vmatprep.mubr.f32.mxu0 %v366_v33  ;;  %v643_v33 = vld [vmem:[%s1800_s7 + $0xe8] sm:$0xff] }
 0x214   :  { %1124 = vmatmul.mubr.f32.gmra.mrb[20].mxu0 %v1072_v31  ;;  %v641_v31 = vld [vmem:[%s1800_s7 + $0xd8] sm:$0xff] }
 0x215   :  { %1126 = vmatprep.mubr.f32.mxu0 %v387_v36  ;;  %v644_v36 = vld [vmem:[%s1800_s7 + $0xf0] sm:$0xff] }
 0x218   :  { %1127 = vmatmul.mubr.f32.gmra.mrb[22].mxu0 %v388_v37  ;;  %v647_v37 = vld [vmem:[%s1800_s7 + $0x108] sm:$0xff] }
 0x219   :  { %1129 = vmatprep.mubr.f32.mxu0 %v389_v38  ;;  %v646_v38 = vld [vmem:[%s1800_s7 + $0x100] sm:$0xff] }
 0x21c   :  { %1130 = vmatmul.mubr.f32.gmra.mrb[24].mxu0 %v390_v39  ;;  %v649_v39 = vld [vmem:[%s1800_s7 + $0x118] sm:$0xff] }
 0x21d   :  { %1132 = vmatprep.mubr.f32.mxu0 %v391_v40  ;;  %v648_v40 = vld [vmem:[%s1800_s7 + $0x110] sm:$0xff] }
 0x220   :  { %1133 = vmatmul.mubr.f32.gmra.mrb[26].mxu0 %v392_v41  ;;  %v651_v41 = vld [vmem:[%s1800_s7 + $0x128] sm:$0xff] }
 0x2d3   :  { %v1110_v43 = vpop.f32.mrb[10].mxu0 }
 0x2d4   :  { %v525_v44 = vpop.f32.mrb[11].mxu0 }
 0x2d5   :  { %v1251_v45 = vpack.c.bf16 %v1110_v43, %v525_v44  ;;  %v653_v43 = vld [vmem:[%s1800_s7 + $0x138] sm:$0xff]  ;;  %v652_v44 = vld [vmem:[%s1800_s7 + $0x130] sm:$0xff] }
 0x2d7   :  { %v1113_v46 = vpop.f32.mrb[12].mxu0  ;;  %1252 = vmatpush1.bf16.msra.mxu1 %v1251_v45 }
 0x2d8   :  { %v535_v47 = vpop.f32.mrb[13].mxu0  ;;  %1253 = vmatprep.subr.bf16.mxu1 %v1288_v20 }
 0x2d9   :  { %v1254_v48 = vpack.c.bf16 %v1113_v46, %v535_v47 }
 0x2db   :  { %v1116_v49 = vpop.f32.mrb[14].mxu0  ;;  %1255 = vmatpush1.bf16.msra.mxu1 %v1254_v48 }
 0x2dc   :  { %v545_v50 = vpop.f32.mrb[15].mxu0  ;;  %1256 = vmatprep.subr.bf16.mxu1 %v1288_v20 }
 0x2dd   :  { %v1257_v51 = vpack.c.bf16 %v1116_v49, %v545_v50 }
 0x2df   :  { %v1119_v52 = vpop.f32.mrb[16].mxu0  ;;  %1258 = vmatpush1.bf16.msra.mxu1 %v1257_v51 }
 0x2e0   :  { %v555_v53 = vpop.f32.mrb[17].mxu0  ;;  %1259 = vmatprep.subr.bf16.mxu1 %v1288_v20 }
 0x2e1   :  { %v1260_v54 = vpack.c.bf16 %v1119_v52, %v555_v53 }
 0x2e3   :  { %v1122_v55 = vpop.f32.mrb[18].mxu0  ;;  %1261 = vmatpush1.bf16.msra.mxu1 %v1260_v54 }
 0x2e4   :  { %v565_v56 = vpop.f32.mrb[19].mxu0  ;;  %1262 = vmatprep.subr.bf16.mxu1 %v1288_v20 }
 0x2e5   :  { %v1263_v57 = vpack.c.bf16 %v1122_v55, %v565_v56 }
 0x2e7   :  { %v1125_v58 = vpop.f32.mrb[20].mxu0  ;;  %1264 = vmatpush1.bf16.msra.mxu1 %v1263_v57 }
 0x2e8   :  { %v575_v59 = vpop.f32.mrb[21].mxu0  ;;  %1265 = vmatprep.subr.bf16.mxu1 %v1288_v20 }
 0x2e9   :  { %v1266_v60 = vpack.c.bf16 %v1125_v58, %v575_v59 }
 0x2eb   :  { %v1128_v61 = vpop.f32.mrb[22].mxu0  ;;  %1267 = vmatpush1.bf16.msra.mxu1 %v1266_v60 }
 0x2ec   :  { %v585_v62 = vpop.f32.mrb[23].mxu0  ;;  %1268 = vmatprep.subr.bf16.mxu1 %v1288_v20 }
 0x2ed   :  { %v1269_v63 = vpack.c.bf16 %v1128_v61, %v585_v62 }
 0x2ef   :  { %v1131_v0 = vpop.f32.mrb[24].mxu0  ;;  %1270 = vmatpush1.bf16.msra.mxu1 %v1269_v63 }
 0x2f0   :  { %v595_v1 = vpop.f32.mrb[25].mxu0  ;;  %1271 = vmatprep.subr.bf16.mxu1 %v1288_v20 }
 0x2f1   :  { %v1272_v2 = vpack.c.bf16 %v1131_v0, %v595_v1 }
 0x2f3   :  { %v1134_v3 = vpop.f32.mrb[26].mxu0  ;;  %1273 = vmatpush1.bf16.msra.mxu1 %v1272_v2 }
 0x2f4   :  { %v605_v4 = vpop.f32.mrb[27].mxu0  ;;  %1274 = vmatprep.subr.bf16.mxu1 %v1288_v20  ;;  %v628_v20 = vld [vmem:[%s1800_s7 + $0x70] sm:$0xff] }
 0x2f5   :  { %v1275_v5 = vpack.c.bf16 %v1134_v3, %v605_v4 }
 0x2f7   :  { %1276 = vmatpush1.bf16.msra.mxu1 %v1275_v5 }
 0x2fa   :  { %779 = vmatmul.mubr.f32.vlgmr.msra.gmra.mrb[4].mxu1 %v614_v6 }
 0x2fb   :  { %979 = vmatprep.mubr.msk.f32.mxu1 %vm194_vm0, %v617_v7 }
 0x2fe   :  { %784 = vmatmul.mubr.f32.gmra.mrb[6].mxu1 %v616_v8 }
 0x2ff   :  { %980 = vmatprep.mubr.msk.f32.mxu1 %vm194_vm0, %v619_v9 }
 0x302   :  { %789 = vmatmul.mubr.f32.gmra.mrb[8].mxu1 %v618_v10 }
 0x303   :  { %981 = vmatprep.mubr.msk.f32.mxu1 %vm194_vm0, %v621_v11 }
 0x306   :  { %794 = vmatmul.mubr.f32.gmra.mrb[10].mxu1 %v620_v12 }
 0x307   :  { %982 = vmatprep.mubr.msk.f32.mxu1 %vm194_vm0, %v623_v13 }
 0x30a   :  { %799 = vmatmul.mubr.f32.gmra.mrb[12].mxu1 %v622_v14 }
 0x30b   :  { %983 = vmatprep.mubr.msk.f32.mxu1 %vm194_vm0, %v625_v15 }
 0x30e   :  { %804 = vmatmul.mubr.f32.gmra.mrb[14].mxu1 %v624_v16 }
 0x30f   :  { %984 = vmatprep.mubr.msk.f32.mxu1 %vm194_vm0, %v627_v17 }
 0x312   :  { %809 = vmatmul.mubr.f32.gmra.mrb[16].mxu1 %v626_v18 }
 0x313   :  { %985 = vmatprep.mubr.msk.f32.mxu1 %vm194_vm0, %v629_v19 }
 0x316   :  { %814 = vmatmul.mubr.f32.gmra.mrb[18].mxu1 %v628_v20 }
 0x317   :  { %986 = vmatprep.mubr.msk.f32.mxu1 %vm194_vm0, %v631_v21 }
 0x31a   :  { %819 = vmatmul.mubr.f32.gmra.mrb[20].mxu1 %v630_v22 }
 0x31b   :  { %987 = vmatprep.mubr.msk.f32.mxu1 %vm194_vm0, %v633_v23 }
 0x31e   :  { %824 = vmatmul.mubr.f32.gmra.mrb[22].mxu1 %v632_v24 }
 0x31f   :  { %988 = vmatprep.mubr.msk.f32.mxu1 %vm194_vm0, %v635_v25 }
 0x322   :  { %829 = vmatmul.mubr.f32.gmra.mrb[24].mxu1 %v634_v26 }
 0x323   :  { %989 = vmatprep.mubr.msk.f32.mxu1 %vm194_vm0, %v637_v27 }
 0x326   :  { %834 = vmatmul.mubr.f32.gmra.mrb[26].mxu1 %v636_v28 }
 0x327   :  { %990 = vmatprep.mubr.msk.f32.mxu1 %vm194_vm0, %v639_v29 }
 0x32a   :  { %839 = vmatmul.mubr.f32.gmra.mrb[28].mxu1 %v638_v30 }
 0x32b   :  { %991 = vmatprep.mubr.msk.f32.mxu1 %vm194_vm0, %v641_v31 }
 0x32e   :  { %844 = vmatmul.mubr.f32.gmra.mrb[30].mxu1 %v640_v32 }
 0x32f   :  { %992 = vmatprep.mubr.msk.f32.mxu1 %vm194_vm0, %v643_v33 }
 0x332   :  { %849 = vmatmul.mubr.f32.gmra.mrb[32].mxu1 %v642_v34 }
 0x333   :  { %993 = vmatprep.mubr.msk.f32.mxu1 %vm194_vm0, %v645_v35 }
 0x336   :  { %854 = vmatmul.mubr.f32.gmra.mrb[34].mxu1 %v644_v36 }
 0x337   :  { %994 = vmatprep.mubr.msk.f32.mxu1 %vm194_vm0, %v647_v37 }
 0x33a   :  { %859 = vmatmul.mubr.f32.gmra.mrb[36].mxu1 %v646_v38 }
 0x33b   :  { %995 = vmatprep.mubr.msk.f32.mxu1 %vm194_vm0, %v649_v39 }
 0x33e   :  { %864 = vmatmul.mubr.f32.gmra.mrb[38].mxu1 %v648_v40 }
 0x33f   :  { %996 = vmatprep.mubr.msk.f32.mxu1 %vm194_vm0, %v651_v41 }
 0x342   :  { %869 = vmatmul.mubr.f32.gmra.mrb[40].mxu1 %v650_v42 }
 0x343   :  { %997 = vmatprep.mubr.msk.f32.mxu1 %vm194_vm0, %v653_v43 }
 0x346   :  { %874 = vmatmul.mubr.f32.gmra.mrb[42].mxu1 %v652_v44 }
 0x3cd   :  { %v780_v45 = vpop.f32.mrb[4].mxu1 }
 0x3ce   :  { %v782_v46 = vpop.f32.mrb[5].mxu1  ;;  %v879_v50 = vmul.f32 %v780_v45, %v780_v45 }
 0x3d1   :  { %v785_v47 = vpop.f32.mrb[6].mxu1 }
 0x3d2   :  { %v787_v48 = vpop.f32.mrb[7].mxu1  ;;  %v880_v56 = vmul.f32 %v785_v47, %v785_v47 }
 0x3d5   :  { %v790_v49 = vpop.f32.mrb[8].mxu1 }
 0x3d6   :  { %v881_v51 = vmul.f32 %v790_v49, %v790_v49  ;;  %v883_v52 = vmul.f32 %v790_v49, %v780_v45  ;;  %v792_v53 = vpop.f32.mrb[9].mxu1 }
 0x3d8   :  { %v897_v54 = vadd.f32 %v881_v51, %v879_v50  ;;  %v885_v14 = vmul.f32 2.0, %v883_v52 }
 0x3d9   :  { %v795_v55 = vpop.f32.mrb[10].mxu1 }
 0x3da   :  { %v882_v57 = vmul.f32 %v795_v55, %v795_v55  ;;  %v884_v58 = vmul.f32 %v795_v55, %v785_v47  ;;  %v797_v59 = vpop.f32.mrb[11].mxu1  ;;  %v899_v8 = vadd.f32 6.5025, %v897_v54  ;;  %v887_v22 = vadd.f32 6.5025, %v885_v14 }
 0x3dc   :  { %v898_v60 = vadd.f32 %v882_v57, %v880_v56  ;;  %v886_v24 = vmul.f32 2.0, %v884_v58 }
 0x3dd   :  { %v800_v61 = vpop.f32.mrb[12].mxu1 }
 0x3de   :  { %v901_v62 = vsub.f32 %v800_v61, %v879_v50  ;;  %v802_v63 = vpop.f32.mrb[13].mxu1  ;;  %v900_v16 = vadd.f32 6.5025, %v898_v60  ;;  %v888_v31 = vadd.f32 6.5025, %v886_v24 }
 0x3e1   :  { %v805_v0 = vpop.f32.mrb[14].mxu1 }
 0x3e2   :  { %v902_v1 = vsub.f32 %v805_v0, %v880_v56  ;;  %v807_v2 = vpop.f32.mrb[15].mxu1 }
 0x3e5   :  { %v810_v3 = vpop.f32.mrb[16].mxu1 }
 0x3e6   :  { %v903_v4 = vsub.f32 %v810_v3, %v881_v51  ;;  %v812_v5 = vpop.f32.mrb[17].mxu1 }
 0x3e8   :  { %v905_v6 = vadd.f32 %v903_v4, %v901_v62 }
 0x3e9   :  { %v815_v7 = vpop.f32.mrb[18].mxu1 }
 0x3ea   :  { %v907_v9 = vadd.f32 58.5225, %v905_v6  ;;  %v904_v10 = vsub.f32 %v815_v7, %v882_v57  ;;  %v817_v11 = vpop.f32.mrb[19].mxu1 }
 0x3ec   :  { %v909_v12 = vmul.f32 %v907_v9, %v899_v8  ;;  %v906_v13 = vadd.f32 %v904_v10, %v902_v1 }
 0x3ed   :  { %v820_v15 = vpop.f32.mrb[20].mxu1 }
 0x3ee   :  { %1280 = vrcp.f32 %v909_v12  ;;  %v908_v17 = vadd.f32 58.5225, %v906_v13  ;;  %v889_v18 = vsub.f32 %v820_v15, %v883_v52  ;;  %v822_v19 = vpop.f32.mrb[21].mxu1 }
 0x3f0   :  { %v910_v20 = vmul.f32 %v908_v17, %v900_v16  ;;  %v891_v21 = vmul.f32 2.0, %v889_v18 }
 0x3f1   :  { %v825_v23 = vpop.f32.mrb[22].mxu1 }
 0x3f2   :  { %1282 = vrcp.f32 %v910_v20  ;;  %v893_v25 = vadd.f32 58.5225, %v891_v21  ;;  %v890_v26 = vsub.f32 %v825_v23, %v884_v58  ;;  %v827_v27 = vpop.f32.mrb[23].mxu1 }
 0x3f4   :  { %v895_v28 = vmul.f32 %v893_v25, %v887_v22  ;;  %v892_v29 = vmul.f32 2.0, %v890_v26 }
 0x3f5   :  { %v830_v30 = vpop.f32.mrb[24].mxu1 }
 0x3f6   :  { %v894_v32 = vadd.f32 58.5225, %v892_v29  ;;  %v832_v33 = vpop.f32.mrb[25].mxu1  ;;  %v922_v42 = vmul.f32 %v830_v30, %v830_v30 }
 0x3f8   :  { %v1281_v34 = vpop.eup %1280  ;;  %v896_v35 = vmul.f32 %v894_v32, %v888_v31 }
 0x3f9   :  { %v912_v36 = vmul.f32 %v1281_v34, %v895_v28  ;;  %v835_v37 = vpop.f32.mrb[26].mxu1 }
 0x3fa   :  { %v837_v38 = vpop.f32.mrb[27].mxu1  ;;  %v923_v49 = vmul.f32 %v835_v37, %v835_v37 }
 0x3fc   :  { %v1283_v39 = vpop.eup %1282 }
 0x3fd   :  { %v914_v40 = vmul.f32 %v1283_v39, %v896_v35  ;;  %v840_v41 = vpop.f32.mrb[28].mxu1 }
 0x3fe   :  { %v924_v43 = vmul.f32 %v840_v41, %v840_v41  ;;  %v926_v44 = vmul.f32 %v840_v41, %v830_v30  ;;  %v842_v45 = vpop.f32.mrb[29].mxu1 }
 0x3ff   :  { %v915_v46 = vadd.f32 %v914_v40, %v912_v36 }
 0x400   :  { %v940_v47 = vadd.f32 %v924_v43, %v922_v42  ;;  %v928_v7 = vmul.f32 2.0, %v926_v44 }
 0x401   :  { %v845_v48 = vpop.f32.mrb[30].mxu1  ;;  %v916_v25 = vrot.slane %v915_v46, 4 }
 0x402   :  { %v925_v50 = vmul.f32 %v845_v48, %v845_v48  ;;  %v927_v51 = vmul.f32 %v845_v48, %v835_v37  ;;  %v847_v52 = vpop.f32.mrb[31].mxu1  ;;  %v942_v1 = vadd.f32 6.5025, %v940_v47  ;;  %v930_v15 = vadd.f32 6.5025, %v928_v7 }
 0x403   :  { %v917_v29 = vadd.f32 %v916_v25, %v915_v46 }
 0x404   :  { %v941_v53 = vadd.f32 %v925_v50, %v923_v49  ;;  %v929_v17 = vmul.f32 2.0, %v927_v51 }
 0x405   :  { %v850_v54 = vpop.f32.mrb[32].mxu1  ;;  %v918_v32 = vrot.slane %v917_v29, 2 }
 0x406   :  { %v944_v55 = vsub.f32 %v850_v54, %v922_v42  ;;  %v852_v56 = vpop.f32.mrb[33].mxu1  ;;  %v943_v9 = vadd.f32 6.5025, %v941_v53  ;;  %v931_v23 = vadd.f32 6.5025, %v929_v17 }
 0x407   :  { %v919_v35 = vadd.f32 %v918_v32, %v917_v29 }
 0x409   :  { %v855_v57 = vpop.f32.mrb[34].mxu1  ;;  %v920_v38 = vrot.slane %v919_v35, 1 }
 0x40a   :  { %v945_v58 = vsub.f32 %v855_v57, %v923_v49  ;;  %v857_v59 = vpop.f32.mrb[35].mxu1 }
 0x40b   :  { %v921_v41 = vadd.f32 %v920_v38, %v919_v35 }
 0x40d   :  { %v860_v60 = vpop.f32.mrb[36].mxu1 }
 0x40e   :  { %v946_v61 = vsub.f32 %v860_v60, %v924_v43  ;;  %v862_v62 = vpop.f32.mrb[37].mxu1 }
 0x410   :  { %v948_v63 = vadd.f32 %v946_v61, %v944_v55 }
 0x411   :  { %v865_v0 = vpop.f32.mrb[38].mxu1 }
 0x412   :  { %v950_v2 = vadd.f32 58.5225, %v948_v63  ;;  %v947_v3 = vsub.f32 %v865_v0, %v925_v50  ;;  %v867_v4 = vpop.f32.mrb[39].mxu1 }
 0x414   :  { %v952_v5 = vmul.f32 %v950_v2, %v942_v1  ;;  %v949_v6 = vadd.f32 %v947_v3, %v945_v58 }
 0x415   :  { %v870_v8 = vpop.f32.mrb[40].mxu1 }
 0x416   :  { %1284 = vrcp.f32 %v952_v5  ;;  %v951_v10 = vadd.f32 58.5225, %v949_v6  ;;  %v932_v11 = vsub.f32 %v870_v8, %v926_v44  ;;  %v872_v12 = vpop.f32.mrb[41].mxu1 }
 0x418   :  { %v953_v13 = vmul.f32 %v951_v10, %v943_v9  ;;  %v934_v14 = vmul.f32 2.0, %v932_v11 }
 0x419   :  { %v875_v16 = vpop.f32.mrb[42].mxu1 }
 0x41a   :  { %1286 = vrcp.f32 %v953_v13  ;;  %v936_v18 = vadd.f32 58.5225, %v934_v14  ;;  %v933_v19 = vsub.f32 %v875_v16, %v927_v51  ;;  %v877_v20 = vpop.f32.mrb[43].mxu1 }
 0x41c   :  { %v938_v21 = vmul.f32 %v936_v18, %v930_v15  ;;  %v935_v22 = vmul.f32 2.0, %v933_v19 }
 0x41e   :  { %v937_v24 = vadd.f32 58.5225, %v935_v22 }
 0x420   :  { %v1285_v26 = vpop.eup %1284  ;;  %v939_v27 = vmul.f32 %v937_v24, %v931_v23 }
 0x421   :  { %v955_v28 = vmul.f32 %v1285_v26, %v938_v21 }
 0x424   :  { %v1287_v30 = vpop.eup %1286 }
 0x425   :  { %v957_v31 = vmul.f32 %v1287_v30, %v939_v27 }
 0x427   :  { %v958_v33 = vadd.f32 %v957_v31, %v955_v28 }
 0x429   :  { %v959_v34 = vrot.slane %v958_v33, 4 }
 0x42b   :  { %v960_v36 = vadd.f32 %v959_v34, %v958_v33 }
 0x42d   :  { %v961_v37 = vrot.slane %v960_v36, 2 }
 0x42f   :  { %v962_v39 = vadd.f32 %v961_v37, %v960_v36 }
 0x431   :  { %v963_v40 = vrot.slane %v962_v39, 1 }
 0x433   :  { %v964_v42 = vadd.f32 %v963_v40, %v962_v39 }
 0x435   :  { %v966_v43 = vsel %vm965_vm1, %v921_v41, %v964_v42 }
 0x436   :  { %967 = vst [vmem:[%s1801_s8] sm:$0x3] %v966_v43 }

</bundles_post_ra>
